<compile_context>
chip_gen: v6e
topology: v6e:2x2x1
jax: 0.10.0
libtpu: 0.0.40
codegen_flags: <defaults>
</compile_context>

<pallas_src>
import jax
import jax.numpy as jnp
from jax.experimental import pallas as pl
from jax.experimental.pallas import tpu as pltpu


def residual_ffn_kernel(x_ref, w1_ref, b1_ref, w2_ref, b2_ref, o_ref):
    """o = gelu(x @ W1 + b1) @ W2 + b2 + x for one (tm, Hp) row tile of x."""
    # First matmul: native-dtype operands straight into the MXU, f32 accumulate.
    h = jnp.dot(x_ref[...], w1_ref[...], preferred_element_type=jnp.float32)
    h = h + b1_ref[...]                                   # (tm, Fp), broadcast (1, Fp)
    # tanh-approximate GELU: transcendental work lands on the EUP slot.
    # (PyTorch nn.GELU default is exact erf; tanh form kept for TPU EUP path.)
    h = jax.nn.gelu(h)
    # Second matmul: cast the activation back to the weight dtype so the MXU
    # consumes native-width operands; accumulator stays f32.
    y = jnp.dot(h.astype(w2_ref.dtype), w2_ref[...],
                preferred_element_type=jnp.float32)
    y = y + b2_ref[...]                                   # (tm, Hp)
    # Residual add: re-read the x tile (cheap vld) rather than holding an f32
    # copy of x live across both matmuls / GELU.
    o_ref[...] = (y + x_ref[...]).astype(o_ref.dtype)


def _round_up(n, m):
    return (n + m - 1) // m * m


def residual_ffn(x, w1, b1, w2, b2, *, tm=512):
    """x: (B, S, H). Returns fn(x) + x with fn = Linear(H,F) -> GELU -> Linear(F,H)."""
    B, S, H = x.shape
    F = w1.shape[1]
    assert w1.shape == (H, F) and w2.shape == (F, H)
    assert b1.shape == (F,) and b2.shape == (H,)
    M = B * S

    # Lane-dense padding of the channel axes (last dims -> multiples of 128).
    # Zero padding is exact for this FFN: gelu(0) == 0 and zero weight
    # rows/cols contribute nothing; padded rows/cols are sliced away below.
    Hp = _round_up(H, 128)
    Fp = _round_up(F, 128)

    # Row tile: large to amortize the ~0.35 us per-grid-step overhead and fill
    # the MXU M axis; clamped for tiny inputs and sublane-aligned.
    row_align = 8 if x.dtype.itemsize >= 4 else 16
    tm = _round_up(max(row_align, min(tm, _round_up(M, row_align))), row_align)
    Mp = _round_up(M, tm)          # pad rows rather than constraining tm

    x2d = jnp.pad(x.reshape(M, H), ((0, Mp - M), (0, Hp - H)))
    w1p = jnp.pad(w1, ((0, Hp - H), (0, Fp - F)))
    b1p = jnp.pad(b1, (0, Fp - F)).reshape(1, Fp)
    w2p = jnp.pad(w2, ((0, Fp - F), (0, Hp - H)))
    b2p = jnp.pad(b2, (0, Hp - H)).reshape(1, Hp)

    # VMEM budget: x/out row tiles are double-buffered by the pipeline, weights
    # are resident (Pallas still allocates 2 buffers for them), plus the f32
    # intermediate. Raise the scoped limit (default 16-32 MiB), capped at
    # 64 MiB so it also fits a v7x TensorCore.
    act_bytes = 4 * tm * Hp * x.dtype.itemsize                       # x + out, 2 bufs each
    wgt_bytes = 2 * (Hp * Fp + Fp + Fp * Hp + Hp) * w1.dtype.itemsize
    tmp_bytes = 2 * tm * Fp * 4                                      # f32 GELU intermediate
    vmem_limit = int(min(max(2 * (act_bytes + wgt_bytes + tmp_bytes), 32 << 20),
                         64 << 20))

    cost = pl.CostEstimate(
        flops=2 * Mp * (Hp * Fp + Fp * Hp),
        transcendentals=Mp * Fp,
        bytes_accessed=(x2d.size * x2d.dtype.itemsize
                        + w1p.size * w1p.dtype.itemsize
                        + b1p.size * b1p.dtype.itemsize
                        + w2p.size * w2p.dtype.itemsize
                        + b2p.size * b2p.dtype.itemsize
                        + Mp * Hp * x.dtype.itemsize),
    )

    # NOTE: weight/bias blocks have constant index_maps and could be
    # single-buffered (pipeline_mode=pl.Buffered(1)) to halve their VMEM
    # residency at production H/F; kept at the default here for portability.
    # TODO(synk): for v7x-scale FFNs (weights > VMEM), add an F-reduction grid
    # axis ("arbitrary", last) with an f32 accumulator scratch to stream W1/W2.
    out2d = pl.pallas_call(
        residual_ffn_kernel,
        out_shape=jax.ShapeDtypeStruct((Mp, Hp), x.dtype),
        grid_spec=pltpu.PrefetchScalarGridSpec(
            num_scalar_prefetch=0,
            grid=(Mp // tm,),
            in_specs=[
                pl.BlockSpec((tm, Hp), lambda i: (i, 0)),   # x row tile
                pl.BlockSpec((Hp, Fp), lambda i: (0, 0)),   # W1 (resident)
                pl.BlockSpec((1, Fp), lambda i: (0, 0)),    # b1
                pl.BlockSpec((Fp, Hp), lambda i: (0, 0)),   # W2 (resident)
                pl.BlockSpec((1, Hp), lambda i: (0, 0)),    # b2
            ],
            out_specs=pl.BlockSpec((tm, Hp), lambda i: (i, 0)),
        ),
        compiler_params=pltpu.CompilerParams(
            dimension_semantics=("parallel",),    # row tiles shard across TCs
            vmem_limit_bytes=vmem_limit,
        ),
        cost_estimate=cost,
    )(x2d, w1p, b1p, w2p, b2p)

    return out2d[:M, :H].reshape(B, S, H)


def reference(x, w1, b1, w2, b2):
    h = jax.nn.gelu(jnp.einsum("bsh,hf->bsf", x, w1) + b1)
    y = jnp.einsum("bsf,fh->bsh", h, w2) + b2
    return y + x


if __name__ == "__main__":
    B, S, H, F = 2, 8, 32, 64

    key = jax.random.PRNGKey(0)
    kx, k1, k2, k3, k4 = jax.random.split(key, 5)

    # Deterministic parameter init (synthetic; no checkpoint loading).
    x = jax.random.normal(kx, (B, S, H), dtype=jnp.float32)
    w1 = jax.random.normal(k1, (H, F), dtype=jnp.float32) * 0.05
    b1 = jax.random.normal(k2, (F,), dtype=jnp.float32) * 0.01
    w2 = jax.random.normal(k3, (F, H), dtype=jnp.float32) * 0.05
    b2 = jax.random.normal(k4, (H,), dtype=jnp.float32) * 0.01

    out = residual_ffn(x, w1, b1, w2, b2)
    out = jax.block_until_ready(out)

    ref = reference(x, w1, b1, w2, b2)
    assert out.shape == x.shape and out.dtype == x.dtype
    assert jnp.allclose(out, ref, atol=1e-4, rtol=1e-4), "mismatch vs reference"

    print("KERNEL_OK")
</pallas_src>

<mosaic_0001>
module attributes {stable_mosaic.version = 11 : i64} {
  func.func @residual_ffn_kernel(%arg0: i32, %arg1: memref<16x128xf32, #tpu.memory_space<vmem>>, %arg2: memref<128x128xf32, #tpu.memory_space<vmem>>, %arg3: memref<1x128xf32, #tpu.memory_space<vmem>>, %arg4: memref<128x128xf32, #tpu.memory_space<vmem>>, %arg5: memref<1x128xf32, #tpu.memory_space<vmem>>, %arg6: memref<16x128xf32, #tpu.memory_space<vmem>>) attributes {dimension_semantics = [#tpu.dimension_semantics<parallel>], iteration_bounds = array<i64: 1>, scalar_prefetch = 0 : i64, scratch_operands = 0 : i64, tpu.core_type = #tpu.core_type<tc>, window_params = [{transform_indices = @transform_0, window_bounds = array<i64: 16, 128>}, {pipeline_mode = #tpu.pipeline_mode<synchronous>, transform_indices = @transform_1, window_bounds = array<i64: 128, 128>}, {pipeline_mode = #tpu.pipeline_mode<synchronous>, transform_indices = @transform_2, window_bounds = array<i64: 1, 128>}, {pipeline_mode = #tpu.pipeline_mode<synchronous>, transform_indices = @transform_3, window_bounds = array<i64: 128, 128>}, {pipeline_mode = #tpu.pipeline_mode<synchronous>, transform_indices = @transform_4, window_bounds = array<i64: 1, 128>}, {transform_indices = @transform_5, window_bounds = array<i64: 16, 128>}]} {
    %c0 = arith.constant 0 : index
    %c0_0 = arith.constant 0 : index
    %0 = vector.load %arg1[%c0, %c0_0] : memref<16x128xf32, #tpu.memory_space<vmem>>, vector<16x128xf32>
    %c0_1 = arith.constant 0 : index
    %c0_2 = arith.constant 0 : index
    %1 = vector.load %arg2[%c0_1, %c0_2] : memref<128x128xf32, #tpu.memory_space<vmem>>, vector<128x128xf32>
    %cst = arith.constant dense<0.000000e+00> : vector<16x128xf32>
    %2 = tpu.matmul %0, %1, %cst {dimension_numbers = #tpu.dot_dimension_numbers<[1], [0], [0], [1], [0, 0, 1, 1], [], []>} : vector<16x128xf32>, vector<128x128xf32>, vector<16x128xf32> -> vector<16x128xf32>
    %c0_3 = arith.constant 0 : index
    %c0_4 = arith.constant 0 : index
    %3 = vector.load %arg3[%c0_3, %c0_4] : memref<1x128xf32, #tpu.memory_space<vmem>>, vector<1x128xf32>
    %4 = vector.broadcast %3 : vector<1x128xf32> to vector<16x128xf32>
    %5 = arith.addf %2, %4 : vector<16x128xf32>
    %6 = arith.mulf %5, %5 : vector<16x128xf32>
    %7 = arith.mulf %5, %6 : vector<16x128xf32>
    %cst_5 = arith.constant 4.471500e-02 : f32
    %8 = vector.broadcast %cst_5 : f32 to vector<16x128xf32>
    %9 = arith.mulf %8, %7 : vector<16x128xf32>
    %10 = arith.addf %5, %9 : vector<16x128xf32>
    %cst_6 = arith.constant 0.797884583 : f32
    %11 = vector.broadcast %cst_6 : f32 to vector<16x128xf32>
    %12 = arith.mulf %11, %10 : vector<16x128xf32>
    %13 = math.tanh %12 : vector<16x128xf32>
    %cst_7 = arith.constant 1.000000e+00 : f32
    %14 = vector.broadcast %cst_7 : f32 to vector<16x128xf32>
    %15 = arith.addf %14, %13 : vector<16x128xf32>
    %cst_8 = arith.constant 5.000000e-01 : f32
    %16 = vector.broadcast %cst_8 : f32 to vector<16x128xf32>
    %17 = arith.mulf %16, %15 : vector<16x128xf32>
    %18 = arith.mulf %5, %17 : vector<16x128xf32>
    %c0_9 = arith.constant 0 : index
    %c0_10 = arith.constant 0 : index
    %19 = vector.load %arg4[%c0_9, %c0_10] : memref<128x128xf32, #tpu.memory_space<vmem>>, vector<128x128xf32>
    %cst_11 = arith.constant dense<0.000000e+00> : vector<16x128xf32>
    %20 = tpu.matmul %18, %19, %cst_11 {dimension_numbers = #tpu.dot_dimension_numbers<[1], [0], [0], [1], [0, 0, 1, 1], [], []>} : vector<16x128xf32>, vector<128x128xf32>, vector<16x128xf32> -> vector<16x128xf32>
    %c0_12 = arith.constant 0 : index
    %c0_13 = arith.constant 0 : index
    %21 = vector.load %arg5[%c0_12, %c0_13] : memref<1x128xf32, #tpu.memory_space<vmem>>, vector<1x128xf32>
    %22 = vector.broadcast %21 : vector<1x128xf32> to vector<16x128xf32>
    %23 = arith.addf %20, %22 : vector<16x128xf32>
    %c0_14 = arith.constant 0 : index
    %c0_15 = arith.constant 0 : index
    %24 = vector.load %arg1[%c0_14, %c0_15] : memref<16x128xf32, #tpu.memory_space<vmem>>, vector<16x128xf32>
    %25 = arith.addf %23, %24 : vector<16x128xf32>
    %c0_16 = arith.constant 0 : index
    %c0_17 = arith.constant 0 : index
    %26 = vector.load %arg6[%c0_16, %c0_17] : memref<16x128xf32, #tpu.memory_space<vmem>>, vector<16x128xf32>
    tpu.vector_store %arg6[%c0_16, %c0_17], %25 {strides = array<i32>} : memref<16x128xf32, #tpu.memory_space<vmem>>, vector<16x128xf32>,
    return
  }
  func.func @transform_0(%arg0: i32) -> (i32, i32) {
    %c0_i32 = arith.constant 0 : i32
    %c0_i32_0 = arith.constant 0 : i32
    return %arg0, %c0_i32 : i32, i32
  }
  func.func @transform_1(%arg0: i32) -> (i32, i32) {
    %c0_i32 = arith.constant 0 : i32
    %c0_i32_0 = arith.constant 0 : i32
    %c0_i32_1 = arith.constant 0 : i32
    return %c0_i32, %c0_i32_0 : i32, i32
  }
  func.func @transform_2(%arg0: i32) -> (i32, i32) {
    %c0_i32 = arith.constant 0 : i32
    %c0_i32_0 = arith.constant 0 : i32
    %c0_i32_1 = arith.constant 0 : i32
    return %c0_i32, %c0_i32_0 : i32, i32
  }
  func.func @transform_3(%arg0: i32) -> (i32, i32) {
    %c0_i32 = arith.constant 0 : i32
    %c0_i32_0 = arith.constant 0 : i32
    %c0_i32_1 = arith.constant 0 : i32
    return %c0_i32, %c0_i32_0 : i32, i32
  }
  func.func @transform_4(%arg0: i32) -> (i32, i32) {
    %c0_i32 = arith.constant 0 : i32
    %c0_i32_0 = arith.constant 0 : i32
    %c0_i32_1 = arith.constant 0 : i32
    return %c0_i32, %c0_i32_0 : i32, i32
  }
  func.func @transform_5(%arg0: i32) -> (i32, i32) {
    %c0_i32 = arith.constant 0 : i32
    %c0_i32_0 = arith.constant 0 : i32
    return %arg0, %c0_i32 : i32, i32
  }
}

</mosaic_0001>

<bundles_post_ra>
// kernel: tpu_custom_call.1
= control target key start
LH: loop header
LB: loop body
LE: loop exit
PB: predicated region body
PF: predicated region fallthrough
CT: control target
= control target key end

     0   :  { %10 = vsyncpa [#allocation3], 0  ;;  %s578_s0 = inlined_call_operand.hbm [shape: f32[16,128], index: 0, kind: input, shape index: {}]   ;;  %s579_s1 = inlined_call_operand.hbm [shape: f32[128,128], index: 1, kind: input, shape index: {}]   ;;  %s580_s2 = inlined_call_operand.vmem [shape: f32[1,128], index: 2, kind: input, shape index: {}]   ;;  %s581_s3 = inlined_call_operand.hbm [shape: f32[128,128], index: 3, kind: input, shape index: {}]   ;;  %s582_s4 = inlined_call_operand.vmem [shape: f32[1,128], index: 4, kind: input, shape index: {}]   ;;  %s583_s5 = inlined_call_operand.hbm [shape: f32[16,128], index: 5, kind: output, shape index: {}]  }
   0x1   :  { %11 = vsyncpa [#allocation6], 0 }
   0x2   :  { %12 = vsyncpa [#allocation4], 0  ;;  %s504_s18 = smov [#allocation5]   ;;  %s505_s20 = smov [#allocation2]  }
   0x3   :  { %s30_s19 = sshll.u32 %s504_s18, 4  ;;  %s18_s21 = sshll.u32 %s505_s20, 4  ;;  %s31_s19 = int_to_ptr.vmem [resolvable:$true] %s30_s19  ;;  %s19_s21 = int_to_ptr.vmem [resolvable:$true] %s18_s21 }
   0x4   :  { %s426_s22 = scalar_lea.vmem %s31_s19, 2048  ;;  %p431_p1 = scmp.lt.s32.totalorder %s31_s19, %s31_s19 }
   0x5   :  { %p427_p0 = scmp.ne.s32.totalorder %s31_s19, %s426_s22  ;;  %p432_p2 = scmp.lt.s32.totalorder %s426_s22, %s426_s22 }
   0x7   :  { %p433_p3 = por %p432_p2, %p431_p1 }
   0x9   :  { %p434_p4 = pnand %p433_p3, %p427_p0 }
   0xb   :  { %437 = shalt.err (!%p434_p4)
}
   0xc   :  { %s506_s23 = smov 128   ;;  %s507_s24 = smov 8  }
   0xd   :  { %36 = dma.hbm_to_vmem [thread:$0]  %s579_s1, 2048, %s31_s19, [#allocation6], %s506_s23, %s506_s23, %s507_s24  }
   0xe   :  { %s446_s27 = scalar_lea.vmem %s19_s21, 256  ;;  %p451_p6 = scmp.lt.s32.totalorder %s19_s21, %s19_s21 }
   0xf   :  { %p447_p5 = scmp.ne.s32.totalorder %s19_s21, %s446_s27  ;;  %p452_p7 = scmp.lt.s32.totalorder %s446_s27, %s446_s27 }
  0x11   :  { %p453_p8 = por %p452_p7, %p451_p6 }
  0x13   :  { %p454_p9 = pnand %p453_p8, %p447_p5 }
  0x15   :  { %457 = shalt.err (!%p454_p9)
}
  0x16   :  { %24 = dma.hbm_to_vmem [thread:$0]  %s578_s0, 256, %s19_s21, [#allocation3], %s506_s23, %s506_s23, %s507_s24  }
  0x17   :  { %s508_s30 = smov [#allocation7]  }
  0x18   :  { %s44_s6 = sshll.u32 %s508_s30, 4  ;;  %s45_s6 = int_to_ptr.vmem [resolvable:$true] %s44_s6 }
  0x19   :  { %s466_s7 = scalar_lea.vmem %s45_s6, 2048  ;;  %p471_p11 = scmp.lt.s32.totalorder %s45_s6, %s45_s6 }
  0x1a   :  { %p467_p10 = scmp.ne.s32.totalorder %s45_s6, %s466_s7  ;;  %p472_p12 = scmp.lt.s32.totalorder %s466_s7, %s466_s7 }
  0x1c   :  { %p473_p13 = por %p472_p12, %p471_p11 }
  0x1e   :  { %p474_p0 = pnand %p473_p13, %p467_p10 }
  0x20   :  { %477 = shalt.err (!%p474_p0)
}
  0x21   :  { %50 = dma.hbm_to_vmem [thread:$0]  %s581_s3, 2048, %s45_s6, [#allocation6], %s506_s23, %s506_s23, %s507_s24  }
  0x22   :  { %498 = dma.done.wait [#allocation3], 256  }
  0x23   :  { %499 = vsyncadd [#allocation3], 4294967040 }
  0x24   :  { %500 = dma.done.wait [#allocation6], 4096  }
  0x25   :  { %501 = vsyncadd [#allocation6], 4294963200  ;;  %v79_v0 = vld [vmem:[#allocation5 + $0x78] sm:$0xff]  ;;  %v78_v1 = vld [vmem:[#allocation5 + $0x70] sm:$0xff]  ;;  %s509_s10 = smov [#allocation8]  }
  0x26   :  { %338 = vmatprep.subr.mxu0 %v79_v0  ;;  %v77_v2 = vld [vmem:[#allocation5 + $0x68] sm:$0xff]  ;;  %v76_v3 = vld [vmem:[#allocation5 + $0x60] sm:$0xff]  ;;  %v558_v4 = vld [vmem:[#allocation2] sm:$0xff]  ;;  %s287_s11 = sshll.u32 %s509_s10, 4  ;;  %s288_s11 = int_to_ptr.vmem [resolvable:$true] %s287_s11 }
  0x27   :  { %339 = vmatpush3.msra.mxu0 %v79_v0  ;;  %v75_v5 = vld [vmem:[#allocation5 + $0x58] sm:$0xff]  ;;  %370 = vmatprep.mubr.f32.mxu0 %v558_v4  ;;  %v74_v6 = vld [vmem:[#allocation5 + $0x50] sm:$0xff]  ;;  %v73_v7 = vld [vmem:[#allocation5 + $0x48] sm:$0xff]  ;;  %s478_s12 = scalar_lea.vmem %s288_s11, 256  ;;  %p483_p2 = scmp.lt.s32.totalorder %s288_s11, %s288_s11 }
  0x28   :  { %340 = vmatprep.subr.mxu0 %v78_v1  ;;  %v72_v8 = vld [vmem:[#allocation5 + $0x40] sm:$0xff]  ;;  %v71_v9 = vld [vmem:[#allocation5 + $0x38] sm:$0xff]  ;;  %v70_v10 = vld [vmem:[#allocation5 + $0x30] sm:$0xff]  ;;  %p479_p1 = scmp.ne.s32.totalorder %s288_s11, %s478_s12  ;;  %p484_p3 = scmp.lt.s32.totalorder %s478_s12, %s478_s12 }
  0x29   :  { %341 = vmatpush3.msra.mxu0 %v78_v1  ;;  %v69_v11 = vld [vmem:[#allocation5 + $0x28] sm:$0xff]  ;;  %v68_v12 = vld [vmem:[#allocation5 + $0x20] sm:$0xff]  ;;  %v67_v13 = vld [vmem:[#allocation5 + $0x18] sm:$0xff] }
  0x2a   :  { %342 = vmatprep.subr.mxu0 %v77_v2  ;;  %v66_v14 = vld [vmem:[#allocation5 + $0x10] sm:$0xff]  ;;  %v65_v15 = vld [vmem:[#allocation5 + $0x8] sm:$0xff]  ;;  %v64_v16 = vld [vmem:[#allocation5] sm:$0xff]  ;;  %p485_p4 = por %p484_p3, %p483_p2 }
  0x2b   :  { %343 = vmatpush3.msra.mxu0 %v77_v2  ;;  %v561_v17 = vld [vmem:[#allocation2 + $0x8] sm:$0xff]  ;;  %v194_v19 = vld [vmem:[#allocation7 + $0x70] sm:$0xff]  ;;  %v193_v20 = vld [vmem:[#allocation7 + $0x68] sm:$0xff] }
  0x2c   :  { %344 = vmatprep.subr.mxu0 %v76_v3  ;;  %v195_v18 = vld [vmem:[#allocation7 + $0x78] sm:$0xff]  ;;  %v192_v21 = vld [vmem:[#allocation7 + $0x60] sm:$0xff]  ;;  %v190_v23 = vld [vmem:[#allocation7 + $0x50] sm:$0xff]  ;;  %p486_p5 = pnand %p485_p4, %p479_p1 }
  0x2d   :  { %345 = vmatpush3.msra.mxu0 %v76_v3  ;;  %373 = vmatprep.subr.mxu1 %v195_v18  ;;  %v191_v22 = vld [vmem:[#allocation7 + $0x58] sm:$0xff]  ;;  %v189_v24 = vld [vmem:[#allocation7 + $0x48] sm:$0xff]  ;;  %v188_v25 = vld [vmem:[#allocation7 + $0x40] sm:$0xff] }
  0x2e   :  { %346 = vmatprep.subr.mxu0 %v75_v5  ;;  %374 = vmatpush3.msra.mxu1 %v195_v18  ;;  %v187_v26 = vld [vmem:[#allocation7 + $0x38] sm:$0xff]  ;;  %v186_v27 = vld [vmem:[#allocation7 + $0x30] sm:$0xff]  ;;  %v185_v28 = vld [vmem:[#allocation7 + $0x28] sm:$0xff] }
  0x2f   :  { %347 = vmatpush3.msra.mxu0 %v75_v5  ;;  %375 = vmatprep.subr.mxu1 %v194_v19  ;;  %v184_v29 = vld [vmem:[#allocation7 + $0x20] sm:$0xff]  ;;  %v183_v30 = vld [vmem:[#allocation7 + $0x18] sm:$0xff]  ;;  %v182_v31 = vld [vmem:[#allocation7 + $0x10] sm:$0xff] }
  0x30   :  { %348 = vmatprep.subr.mxu0 %v74_v6  ;;  %376 = vmatpush3.msra.mxu1 %v194_v19  ;;  %v181_v32 = vld [vmem:[#allocation7 + $0x8] sm:$0xff]  ;;  %v180_v33 = vld [vmem:[#allocation7] sm:$0xff]  ;;  %v300_v34 = vld [vmem:[%s580_s2] ss:$0 sm:$0xff] }
  0x31   :  { %349 = vmatpush3.msra.mxu0 %v74_v6  ;;  %377 = vmatprep.subr.mxu1 %v193_v20  ;;  %v301_v57 = vld [vmem:[%s582_s4] ss:$0 sm:$0xff] }
  0x32   :  { %350 = vmatprep.subr.mxu0 %v73_v7  ;;  %378 = vmatpush3.msra.mxu1 %v193_v20 }
  0x33   :  { %351 = vmatpush3.msra.mxu0 %v73_v7  ;;  %379 = vmatprep.subr.mxu1 %v192_v21 }
  0x34   :  { %352 = vmatprep.subr.mxu0 %v72_v8  ;;  %380 = vmatpush3.msra.mxu1 %v192_v21 }
  0x35   :  { %353 = vmatpush3.msra.mxu0 %v72_v8  ;;  %381 = vmatprep.subr.mxu1 %v191_v22 }
  0x36   :  { %354 = vmatprep.subr.mxu0 %v71_v9  ;;  %382 = vmatpush3.msra.mxu1 %v191_v22 }
  0x37   :  { %355 = vmatpush3.msra.mxu0 %v71_v9  ;;  %383 = vmatprep.subr.mxu1 %v190_v23 }
  0x38   :  { %356 = vmatprep.subr.mxu0 %v70_v10  ;;  %384 = vmatpush3.msra.mxu1 %v190_v23 }
  0x39   :  { %357 = vmatpush3.msra.mxu0 %v70_v10  ;;  %385 = vmatprep.subr.mxu1 %v189_v24 }
  0x3a   :  { %358 = vmatprep.subr.mxu0 %v69_v11  ;;  %386 = vmatpush3.msra.mxu1 %v189_v24 }
  0x3b   :  { %359 = vmatpush3.msra.mxu0 %v69_v11  ;;  %387 = vmatprep.subr.mxu1 %v188_v25 }
  0x3c   :  { %360 = vmatprep.subr.mxu0 %v68_v12  ;;  %388 = vmatpush3.msra.mxu1 %v188_v25 }
  0x3d   :  { %361 = vmatpush3.msra.mxu0 %v68_v12  ;;  %389 = vmatprep.subr.mxu1 %v187_v26 }
  0x3e   :  { %362 = vmatprep.subr.mxu0 %v67_v13  ;;  %390 = vmatpush3.msra.mxu1 %v187_v26 }
  0x3f   :  { %363 = vmatpush3.msra.mxu0 %v67_v13  ;;  %391 = vmatprep.subr.mxu1 %v186_v27 }
  0x40   :  { %364 = vmatprep.subr.mxu0 %v66_v14  ;;  %392 = vmatpush3.msra.mxu1 %v186_v27 }
  0x41   :  { %365 = vmatpush3.msra.mxu0 %v66_v14  ;;  %393 = vmatprep.subr.mxu1 %v185_v28 }
  0x42   :  { %366 = vmatprep.subr.mxu0 %v65_v15  ;;  %394 = vmatpush3.msra.mxu1 %v185_v28 }
  0x43   :  { %367 = vmatpush3.msra.mxu0 %v65_v15  ;;  %395 = vmatprep.subr.mxu1 %v184_v29 }
  0x44   :  { %368 = vmatprep.subr.mxu0 %v64_v16  ;;  %396 = vmatpush3.msra.mxu1 %v184_v29 }
  0x45   :  { %369 = vmatpush3.msra.mxu0 %v64_v16  ;;  %397 = vmatprep.subr.mxu1 %v183_v30 }
  0x46   :  { %371 = vmatmul.mubr.f32.vlgmr.msra.gmra.mxu0 %v561_v17  ;;  %398 = vmatpush3.msra.mxu1 %v183_v30 }
  0x47   :  { %399 = vmatprep.subr.mxu1 %v182_v31 }
  0x48   :  { %400 = vmatpush3.msra.mxu1 %v182_v31 }
  0x49   :  { %401 = vmatprep.subr.mxu1 %v181_v32 }
  0x4a   :  { %402 = vmatpush3.msra.mxu1 %v181_v32 }
  0x4b   :  { %403 = vmatprep.subr.mxu1 %v180_v33 }
  0x4c   :  { %404 = vmatpush3.msra.mxu1 %v180_v33 }
 0x106   :  { %v372_v35 = vpop.f32.mrf.mxu0 }
 0x107   :  { %v159_v36 = vadd.f32 %v372_v35, %v300_v34 }
 0x108   :  { %v153_v37 = vpop.f32.mrf.mxu0 }
 0x109   :  { %v163_v38 = vmul.f32 %v159_v36, %v159_v36  ;;  %v154_v39 = vadd.f32 %v300_v34, %v153_v37 }
 0x10b   :  { %v165_v40 = vmul.f32 %v163_v38, %v159_v36  ;;  %v162_v41 = vmul.f32 %v154_v39, %v154_v39 }
 0x10d   :  { %v167_v42 = vmul.f32 0.044715, %v165_v40  ;;  %v164_v43 = vmul.f32 %v162_v41, %v154_v39 }
 0x10f   :  { %v169_v44 = vadd.f32 %v167_v42, %v159_v36  ;;  %v166_v45 = vmul.f32 0.044715, %v164_v43 }
 0x111   :  { %v171_v46 = vmul.f32 0.7978846, %v169_v44  ;;  %v168_v47 = vadd.f32 %v166_v45, %v154_v39 }
 0x113   :  { %414 = vtanh.f32 %v171_v46  ;;  %v170_v48 = vmul.f32 0.7978846, %v168_v47 }
 0x115   :  { %416 = vtanh.f32 %v170_v48 }
 0x120   :  { %v415_v49 = vpop.eup %414 }
 0x121   :  { %v175_v50 = vadd.f32 1.0, %v415_v49 }
 0x122   :  { %v417_v51 = vpop.eup %416 }
 0x123   :  { %v174_v52 = vadd.f32 1.0, %v417_v51  ;;  %v177_v53 = vmul.f32 0.5, %v175_v50 }
 0x125   :  { %v176_v54 = vmul.f32 0.5, %v174_v52  ;;  %v179_v56 = vmul.f32 %v177_v53, %v159_v36 }
 0x127   :  { %v178_v55 = vmul.f32 %v176_v54, %v154_v39 }
 0x129   :  { %405 = vmatprep.mubr.f32.mxu1 %v178_v55 }
 0x12a   :  { %406 = vmatmul.mubr.f32.vlgmr.msra.gmra.mxu1 %v179_v56 }
 0x1ea   :  { %v407_v58 = vpop.f32.mrf.mxu1 }
 0x1eb   :  { %v275_v59 = vadd.f32 %v407_v58, %v301_v57 }
 0x1ec   :  { %v269_v60 = vpop.f32.mrf.mxu1 }
 0x1ed   :  { %v279_v61 = vadd.f32 %v275_v59, %v561_v17  ;;  %v270_v62 = vadd.f32 %v301_v57, %v269_v60 }
 0x1ef   :  { %281 = vst [vmem:[#allocation8 + $0x8] sm:$0xff] %v279_v61  ;;  %v278_v63 = vadd.f32 %v270_v62, %v558_v4 }
 0x1f1   :  { %280 = vst [vmem:[#allocation8] sm:$0xff] %v278_v63 }
 0x1f2   :  { %489 = shalt.err (!%p486_p5)
}
 0x1f3   :  { %293 = dma.vmem_to_hbm [thread:$0]  %s288_s11, 256, %s583_s5, [#allocation4], %s506_s23, %s506_s23, %s507_s24  }
 0x1f4   :  { %502 = dma.done.wait [#allocation4], 256  }
 0x1f5   :  { %503 = vsyncadd [#allocation4], 4294967040 }
 0x1f6   :  { %297 = vsyncpa [#allocation3], 1 }
 0x1f7   :  { %298 = vsyncpa [#allocation6], 1 }
 0x1f8   :  { %299 = vsyncpa [#allocation4], 1 }

</bundles_post_ra>
